<compile_context>
chip_gen: v5e
topology: v5e:2x2
jax: 0.10.0
libtpu: 0.0.40
codegen_flags: <defaults>
</compile_context>

<pallas_src>
import functools
import math

import jax
import jax.numpy as jnp
from jax.experimental import pallas as pl
from jax.experimental.pallas import tpu as pltpu


def _round_up(n, m):
    return ((n + m - 1) // m) * m


def timestep_embedder_kernel(t_ref, w1_ref, b1_ref, w2_ref, b2_ref, o_ref, *,
                             half, max_period):
    # --- sinusoidal timestep embedding (f32) ---
    t = t_ref[...].astype(jnp.float32)                                  # (tm, 1)
    k = jax.lax.broadcasted_iota(jnp.int32, (1, half), 1).astype(jnp.float32)
    freqs = jnp.exp((-math.log(max_period) / half) * k)                 # (1, half)
    args = t * freqs                                                    # (tm, half)
    emb = jnp.concatenate([jnp.cos(args), jnp.sin(args)], axis=-1)      # (tm, 2*half)

    # --- MLP: fc1 -> SiLU -> fc2 (bf16 MXU operands, f32 accumulation) ---
    emb = emb.astype(w1_ref.dtype)                                      # matches .to(self.dtype)
    h = jnp.dot(emb, w1_ref[...], preferred_element_type=jnp.float32)
    h = h + b1_ref[...].astype(jnp.float32)
    h = h * jax.nn.sigmoid(h)                                           # SiLU in f32
    h = h.astype(w2_ref.dtype)
    y = jnp.dot(h, w2_ref[...], preferred_element_type=jnp.float32)
    y = y + b2_ref[...].astype(jnp.float32)
    o_ref[...] = y.astype(o_ref.dtype)


def timestep_embedder(t, w1, b1, w2, b2, *, max_period=10000,
                      out_dtype=jnp.bfloat16):
    """t: (N,) scalar timesteps -> (N, hidden_size) embedding."""
    (N,) = t.shape
    D, H = w1.shape            # frequency_embedding_size, hidden_size
    assert D % 2 == 0, "frequency_embedding_size must be even"
    # TODO(synk): odd `dim` zero-pad branch of timestep_embedding not needed (D=256 even).
    half = D // 2

    # Row tile: 256 rows for large batches (fills the 256-wide v6e/v7x MXU and
    # amortizes per-grid-step overhead); for small batches just round up to the
    # (8,·) sublane granule so grid=(1,) and nothing is wasted.
    tm = 256 if N >= 256 else _round_up(max(N, 1), 8)
    Mp = _round_up(N, tm)
    grid = (Mp // tm,)

    t2 = jnp.pad(t.astype(jnp.float32).reshape(N, 1), ((0, Mp - N), (0, 0)))
    b1_2 = b1.reshape(1, H)
    b2_2 = b2.reshape(1, H)

    out = pl.pallas_call(
        functools.partial(timestep_embedder_kernel, half=half, max_period=max_period),
        out_shape=jax.ShapeDtypeStruct((Mp, H), out_dtype),
        grid_spec=pltpu.PrefetchScalarGridSpec(
            num_scalar_prefetch=0,
            grid=grid,
            in_specs=[
                pl.BlockSpec((tm, 1), lambda i: (i, 0)),     # timestep rows
                pl.BlockSpec((D, H), lambda i: (0, 0)),      # fc1 weight (grid-invariant)
                pl.BlockSpec((1, H), lambda i: (0, 0)),      # fc1 bias
                pl.BlockSpec((H, H), lambda i: (0, 0)),      # fc2 weight (grid-invariant)
                pl.BlockSpec((1, H), lambda i: (0, 0)),      # fc2 bias
            ],
            out_specs=pl.BlockSpec((tm, H), lambda i: (i, 0)),
        ),
        compiler_params=pltpu.CompilerParams(
            dimension_semantics=("parallel",),
        ),
    )(t2, w1, b1_2, w2, b2_2)

    return out[:N]


def reference_timestep_embedder(t, w1, b1, w2, b2, *, max_period=10000,
                                out_dtype=jnp.bfloat16):
    """Pure-JAX reference mirroring the PyTorch module (bf16 mlp, f32 accum)."""
    D, H = w1.shape
    half = D // 2
    freqs = jnp.exp(-math.log(max_period) *
                    jnp.arange(half, dtype=jnp.float32) / half)
    args = t.astype(jnp.float32)[:, None] * freqs[None]
    emb = jnp.concatenate([jnp.cos(args), jnp.sin(args)], axis=-1)
    emb = emb.astype(w1.dtype)
    h = jnp.dot(emb, w1, preferred_element_type=jnp.float32) + b1.astype(jnp.float32)
    h = h * jax.nn.sigmoid(h)
    y = jnp.dot(h.astype(w2.dtype), w2,
                preferred_element_type=jnp.float32) + b2.astype(jnp.float32)
    return y.astype(out_dtype)


if __name__ == "__main__":
    # Small shapes consistent with the module: N timesteps, freq dim 256, hidden 128.
    N, D, H = 8, 256, 128

    key = jax.random.PRNGKey(0)
    k_t, k_w1, k_b1, k_w2, k_b2 = jax.random.split(key, 5)

    t = 1000.0 * jax.random.uniform(k_t, (N,), dtype=jnp.float32)

    # Synthetic parameters, bf16 (module default dtype=torch.bfloat16).
    # Stored as (in, out) so y = x @ W + b matches nn.Linear semantics.
    w1 = (0.05 * jax.random.normal(k_w1, (D, H), dtype=jnp.float32)).astype(jnp.bfloat16)
    b1 = (0.01 * jax.random.normal(k_b1, (H,), dtype=jnp.float32)).astype(jnp.bfloat16)
    w2 = (0.05 * jax.random.normal(k_w2, (H, H), dtype=jnp.float32)).astype(jnp.bfloat16)
    b2 = (0.01 * jax.random.normal(k_b2, (H,), dtype=jnp.float32)).astype(jnp.bfloat16)

    y = timestep_embedder(t, w1, b1, w2, b2)
    y = jax.block_until_ready(y)

    y_ref = reference_timestep_embedder(t, w1, b1, w2, b2)

    assert y.shape == (N, H), y.shape
    err = jnp.max(jnp.abs(y.astype(jnp.float32) - y_ref.astype(jnp.float32)))
    assert jnp.allclose(y.astype(jnp.float32), y_ref.astype(jnp.float32),
                        atol=5e-2, rtol=5e-2), float(err)

    print("KERNEL_OK")
</pallas_src>

<mosaic_0001>
module attributes {stable_mosaic.version = 11 : i64} {
  func.func @timestep_embedder_kernel(%arg0: i32, %arg1: memref<8x1xf32, #tpu.memory_space<vmem>>, %arg2: memref<256x128xbf16, #tpu.memory_space<vmem>>, %arg3: memref<1x128xbf16, #tpu.memory_space<vmem>>, %arg4: memref<128x128xbf16, #tpu.memory_space<vmem>>, %arg5: memref<1x128xbf16, #tpu.memory_space<vmem>>, %arg6: memref<8x128xbf16, #tpu.memory_space<vmem>>) attributes {dimension_semantics = [#tpu.dimension_semantics<parallel>], iteration_bounds = array<i64: 1>, scalar_prefetch = 0 : i64, scratch_operands = 0 : i64, tpu.core_type = #tpu.core_type<tc>, window_params = [{transform_indices = @transform_0, window_bounds = array<i64: 8, 1>}, {pipeline_mode = #tpu.pipeline_mode<synchronous>, transform_indices = @transform_1, window_bounds = array<i64: 256, 128>}, {pipeline_mode = #tpu.pipeline_mode<synchronous>, transform_indices = @transform_2, window_bounds = array<i64: 1, 128>}, {pipeline_mode = #tpu.pipeline_mode<synchronous>, transform_indices = @transform_3, window_bounds = array<i64: 128, 128>}, {pipeline_mode = #tpu.pipeline_mode<synchronous>, transform_indices = @transform_4, window_bounds = array<i64: 1, 128>}, {transform_indices = @transform_5, window_bounds = array<i64: 8, 128>}]} {
    %c0 = arith.constant 0 : index
    %c0_0 = arith.constant 0 : index
    %0 = vector.load %arg1[%c0, %c0_0] : memref<8x1xf32, #tpu.memory_space<vmem>>, vector<8x1xf32>
    %1 = tpu.iota {dimensions = array<i32: 1>} : vector<1x128xi32>
    %2 = arith.sitofp %1 : vector<1x128xi32> to vector<1x128xf32>
    %cst = arith.constant -0.0719557852 : f32
    %3 = vector.broadcast %cst : f32 to vector<1x128xf32>
    %4 = arith.mulf %3, %2 : vector<1x128xf32>
    %5 = math.exp %4 : vector<1x128xf32>
    %6 = vector.broadcast %0 : vector<8x1xf32> to vector<8x128xf32>
    %7 = vector.broadcast %5 : vector<1x128xf32> to vector<8x128xf32>
    %8 = arith.mulf %6, %7 : vector<8x128xf32>
    %9 = math.cos %8 : vector<8x128xf32>
    %10 = math.sin %8 : vector<8x128xf32>
    %11 = tpu.concatenate %9, %10 in 1 : vector<8x128xf32>, vector<8x128xf32> -> vector<8x256xf32>
    %12 = arith.truncf %11 : vector<8x256xf32> to vector<8x256xbf16>
    %c0_1 = arith.constant 0 : index
    %c0_2 = arith.constant 0 : index
    %13 = vector.load %arg2[%c0_1, %c0_2] : memref<256x128xbf16, #tpu.memory_space<vmem>>, vector<256x128xbf16>
    %cst_3 = arith.constant dense<0.000000e+00> : vector<8x128xf32>
    %14 = tpu.matmul %12, %13, %cst_3 {dimension_numbers = #tpu.dot_dimension_numbers<[1], [0], [0], [1], [0, 0, 1, 1], [], []>} : vector<8x256xbf16>, vector<256x128xbf16>, vector<8x128xf32> -> vector<8x128xf32>
    %c0_4 = arith.constant 0 : index
    %c0_5 = arith.constant 0 : index
    %15 = vector.load %arg3[%c0_4, %c0_5] : memref<1x128xbf16, #tpu.memory_space<vmem>>, vector<1x128xbf16>
    %16 = arith.extf %15 : vector<1x128xbf16> to vector<1x128xf32>
    %17 = vector.broadcast %16 : vector<1x128xf32> to vector<8x128xf32>
    %18 = arith.addf %14, %17 : vector<8x128xf32>
    %19 = arith.negf %18 : vector<8x128xf32>
    %20 = math.exp %19 : vector<8x128xf32>
    %cst_6 = arith.constant 1.000000e+00 : f32
    %21 = vector.broadcast %cst_6 : f32 to vector<8x128xf32>
    %22 = arith.addf %21, %20 : vector<8x128xf32>
    %23 = arith.divf %21, %22 : vector<8x128xf32>
    %24 = arith.mulf %18, %23 : vector<8x128xf32>
    %25 = arith.truncf %24 : vector<8x128xf32> to vector<8x128xbf16>
    %c0_7 = arith.constant 0 : index
    %c0_8 = arith.constant 0 : index
    %26 = vector.load %arg4[%c0_7, %c0_8] : memref<128x128xbf16, #tpu.memory_space<vmem>>, vector<128x128xbf16>
    %cst_9 = arith.constant dense<0.000000e+00> : vector<8x128xf32>
    %27 = tpu.matmul %25, %26, %cst_9 {dimension_numbers = #tpu.dot_dimension_numbers<[1], [0], [0], [1], [0, 0, 1, 1], [], []>} : vector<8x128xbf16>, vector<128x128xbf16>, vector<8x128xf32> -> vector<8x128xf32>
    %c0_10 = arith.constant 0 : index
    %c0_11 = arith.constant 0 : index
    %28 = vector.load %arg5[%c0_10, %c0_11] : memref<1x128xbf16, #tpu.memory_space<vmem>>, vector<1x128xbf16>
    %29 = arith.extf %28 : vector<1x128xbf16> to vector<1x128xf32>
    %30 = vector.broadcast %29 : vector<1x128xf32> to vector<8x128xf32>
    %31 = arith.addf %27, %30 : vector<8x128xf32>
    %32 = arith.truncf %31 : vector<8x128xf32> to vector<8x128xbf16>
    %c0_12 = arith.constant 0 : index
    %c0_13 = arith.constant 0 : index
    %33 = vector.load %arg6[%c0_12, %c0_13] : memref<8x128xbf16, #tpu.memory_space<vmem>>, vector<8x128xbf16>
    tpu.vector_store %arg6[%c0_12, %c0_13], %32 {strides = array<i32>} : memref<8x128xbf16, #tpu.memory_space<vmem>>, vector<8x128xbf16>,
    return
  }
  func.func @transform_0(%arg0: i32) -> (i32, i32) {
    %c0_i32 = arith.constant 0 : i32
    %c0_i32_0 = arith.constant 0 : i32
    return %arg0, %c0_i32 : i32, i32
  }
  func.func @transform_1(%arg0: i32) -> (i32, i32) {
    %c0_i32 = arith.constant 0 : i32
    %c0_i32_0 = arith.constant 0 : i32
    %c0_i32_1 = arith.constant 0 : i32
    return %c0_i32, %c0_i32_0 : i32, i32
  }
  func.func @transform_2(%arg0: i32) -> (i32, i32) {
    %c0_i32 = arith.constant 0 : i32
    %c0_i32_0 = arith.constant 0 : i32
    %c0_i32_1 = arith.constant 0 : i32
    return %c0_i32, %c0_i32_0 : i32, i32
  }
  func.func @transform_3(%arg0: i32) -> (i32, i32) {
    %c0_i32 = arith.constant 0 : i32
    %c0_i32_0 = arith.constant 0 : i32
    %c0_i32_1 = arith.constant 0 : i32
    return %c0_i32, %c0_i32_0 : i32, i32
  }
  func.func @transform_4(%arg0: i32) -> (i32, i32) {
    %c0_i32 = arith.constant 0 : i32
    %c0_i32_0 = arith.constant 0 : i32
    %c0_i32_1 = arith.constant 0 : i32
    return %c0_i32, %c0_i32_0 : i32, i32
  }
  func.func @transform_5(%arg0: i32) -> (i32, i32) {
    %c0_i32 = arith.constant 0 : i32
    %c0_i32_0 = arith.constant 0 : i32
    return %arg0, %c0_i32 : i32, i32
  }
}

</mosaic_0001>

<bundles_post_ra>
// kernel: tpu_custom_call.1
= control target key start
LH: loop header
LB: loop body
LE: loop exit
PB: predicated region body
PF: predicated region fallthrough
CT: control target
= control target key end

     0   :  { %10 = vsyncpa [#allocation3], 0  ;;  %s1000_s0 = inlined_call_operand.vmem [shape: f32[8,1], index: 0, kind: input, shape index: {}]   ;;  %s1001_s1 = inlined_call_operand.hbm [shape: bf16[256,128], index: 1, kind: input, shape index: {}]   ;;  %s1002_s2 = inlined_call_operand.vmem [shape: bf16[1,128], index: 2, kind: input, shape index: {}]   ;;  %s1003_s3 = inlined_call_operand.hbm [shape: bf16[128,128], index: 3, kind: input, shape index: {}]   ;;  %s1004_s4 = inlined_call_operand.vmem [shape: bf16[1,128], index: 4, kind: input, shape index: {}]   ;;  %s1005_s5 = inlined_call_operand.hbm [shape: bf16[8,128], index: 5, kind: output, shape index: {}]  }
   0x1   :  { %11 = vsyncpa [#allocation6], 0 }
   0x2   :  { %12 = vsyncpa [#allocation4], 0  ;;  %s19_s20 = sshll.u32 %s1001_s1, 4  ;;  %s879_s21 = smov [#allocation2]   ;;  %s20_s20 = int_to_ptr.hbm [resolvable:$true] %s19_s20 }
   0x3   :  { %s21_s22 = sshll.u32 %s879_s21, 4  ;;  %s34_s25 = sshll.u32 %s1003_s3, 4  ;;  %s22_s22 = int_to_ptr.vmem [resolvable:$true] %s21_s22  ;;  %s35_s25 = int_to_ptr.hbm [resolvable:$true] %s34_s25 }
   0x4   :  { %s880_s26 = smov 64   ;;  %s881_s27 = smov 4  }
   0x5   :  { %27 = dma.hbm_to_vmem [thread:$0]  %s20_s20, 2048, %s22_s22, [#allocation3], %s880_s26, %s880_s26, %s881_s27  }
   0x6   :  { %s882_s28 = smov [#allocation5]  }
   0x7   :  { %s36_s29 = sshll.u32 %s882_s28, 4  ;;  %s37_s29 = int_to_ptr.vmem [resolvable:$true] %s36_s29 }
   0x8   :  { %42 = dma.hbm_to_vmem [thread:$0]  %s35_s25, 1024, %s37_s29, [#allocation6], %s880_s26, %s880_s26, %s881_s27  }
   0x9   :  { %873 = dma.done.wait [#allocation3], 2048  }
   0xa   :  { %874 = vsyncadd [#allocation3], 4294965248 }
   0xb   :  { %875 = dma.done.wait [#allocation6], 1024  }
   0xc   :  { %876 = vsyncadd [#allocation6], 4294966272  ;;  %v883_v0 = vmov 0   ;;  %v53_v1 = vld [vmem:[%s1000_s0] sm:$0xff]  ;;  %v54_v2 = vlaneseq  ;;  %v765_v7 = vld [vmem:[#allocation2 + $0x38] sm:$0xff]  ;;  %s890_s7 = smov [#allocation7]  }
   0xd   :  { %794 = vset.pattern.permute.xlu0 %v883_v0  ;;  %v773_v8 = vld [vmem:[#allocation2 + $0x78] sm:$0xff]  ;;  %508 = vmatpush.bf16.msra.mxu0 %v765_v7  ;;  %v764_v9 = vld [vmem:[#allocation2 + $0x30] sm:$0xff]  ;;  %v763_v11 = vld [vmem:[#allocation2 + $0x28] sm:$0xff]  ;;  %v884_v35 = vmov 683565275   ;;  %s642_s8 = sshll.u32 %s890_s7, 4  ;;  %s643_s8 = int_to_ptr.vmem [resolvable:$true] %s642_s8 }
   0xe   :  { %62 = vperm.xlu0 %794, %v53_v1   ;;  %v55_v3 = vand.u32 127, %v54_v2  ;;  %521 = vmatpush.bf16.msra.mxu1 %v773_v8  ;;  %v772_v10 = vld [vmem:[#allocation2 + $0x70] sm:$0xff]  ;;  %v771_v12 = vld [vmem:[#allocation2 + $0x68] sm:$0xff]  ;;  %v762_v16 = vld [vmem:[#allocation2 + $0x20] sm:$0xff]  ;;  %v885_v37 = vmov 2475754826  }
   0xf   :  { %v770_v17 = vld [vmem:[#allocation2 + $0x60] sm:$0xff]  ;;  %v761_v20 = vld [vmem:[#allocation2 + $0x18] sm:$0xff]  ;;  %v760_v25 = vld [vmem:[#allocation2 + $0x10] sm:$0xff]  ;;  %v886_v39 = vmov 2131351028   ;;  %s644_s11 = sshll.u32 %s1005_s5, 4  ;;  %s645_s11 = int_to_ptr.hbm [resolvable:$true] %s644_s11 }
  0x10   :  { %v56_v4 = vcvt.s32.f32 %v55_v3  ;;  %v769_v21 = vld [vmem:[#allocation2 + $0x58] sm:$0xff]  ;;  %v768_v26 = vld [vmem:[#allocation2 + $0x50] sm:$0xff]  ;;  %v759_v30 = vld [vmem:[#allocation2 + $0x8] sm:$0xff]  ;;  %v887_v41 = vmov 2102212464  }
  0x11   :  { %509 = vmatpush.bf16.msra.mxu0 %v764_v9  ;;  %v767_v32 = vld [vmem:[#allocation2 + $0x48] sm:$0xff]  ;;  %v888_v46 = vmov 920167782   ;;  %v758_v48 = vld [vmem:[#allocation2] sm:$0xff]  ;;  %v889_v50 = vmov 1326507024  }
  0x12   :  { %v57_v5 = vmul.f32 -0.071955785, %v56_v4  ;;  %522 = vmatpush.bf16.msra.mxu1 %v772_v10  ;;  %v766_v53 = vld [vmem:[#allocation2 + $0x40] sm:$0xff] }
  0x14   :  { %v58_v6 = vmul.f32 1.442695, %v57_v5 }
  0x15   :  { %510 = vmatpush.bf16.msra.mxu0 %v763_v11 }
  0x16   :  { %795 = vpow2.f32 %v58_v6  ;;  %523 = vmatpush.bf16.msra.mxu1 %v771_v12 }
  0x19   :  { %511 = vmatpush.bf16.msra.mxu0 %v762_v16 }
  0x1a   :  { %524 = vmatpush.bf16.msra.mxu1 %v770_v17 }
  0x1c   :  { %v796_v13 = vpop.eup %795 }
  0x1d   :  { %512 = vmatpush.bf16.msra.mxu0 %v761_v20 }
  0x1e   :  { %525 = vmatpush.bf16.msra.mxu1 %v769_v21 }
  0x21   :  { %513 = vmatpush.bf16.msra.mxu0 %v760_v25 }
  0x22   :  { %526 = vmatpush.bf16.msra.mxu1 %v768_v26 }
  0x25   :  { %514 = vmatpush.bf16.msra.mxu0 %v759_v30 }
  0x26   :  { %527 = vmatpush.bf16.msra.mxu1 %v767_v32 }
  0x29   :  { %515 = vmatpush.bf16.msra.mxu0 %v758_v48 }
  0x2a   :  { %528 = vmatpush.bf16.msra.mxu1 %v766_v53 }
  0x80   :  { %v63_v14 = vpop.permute.xlu0 %62 }
  0x81   :  { %v931_v15 = vmul.f32 %v796_v13, %v63_v14 }
  0x83   :  { %v69_v18 = vand.u32 2139095040, %v931_v15  ;;  %v66_v22 = vand.u32 2147483647, %v931_v15  ;;  %vm68_vm12 = vcmp.lt.s32.totalorder %v931_v15, 0 }
  0x85   :  { %v70_v19 = vshrl.u32 %v69_v18, 23  ;;  %v73_v27 = vand.u32 8388607, %v66_v22  ;;  %vm67_vm13 = vcmp.le.f32.partialorder %v66_v22, 0.7853982 }
  0x87   :  { %v655_v23 = vadd.s32 4294967169, %v70_v19  ;;  %v74_v31 = vor.u32 8388608, %v73_v27 }
  0x89   :  { %v76_v24 = vadd.s32 1, %v655_v23  ;;  %v947_v52 = vshll.u32 %v74_v31, 8 }
  0x8b   :  { %vm77_vm0 = vcmp.gt.s32.totalorder %v76_v24, 0  ;;  %v115_v2 = vand.u32 65535, %v947_v52  ;;  %v116_v4 = vshrl.u32 %v947_v52, 16 }
  0x8c   :  { %v78_v28 = vsel %vm77_vm0, %v76_v24, 0 }
  0x8d   :  { %v80_v29 = vand.u32 31, %v78_v28  ;;  %v937_v33 = vshrl.u32 %v78_v28, 5 }
  0x8f   :  { %v939_v34 = vsub.s32 32, %v80_v29  ;;  %v83_v36 = vshll.u32 %v884_v35, %v80_v29  ;;  %v86_v38 = vshll.u32 %v885_v37, %v80_v29  ;;  %v89_v40 = vshll.u32 %v886_v39, %v80_v29 }
  0x90   :  { %v92_v42 = vshll.u32 %v887_v41, %v80_v29  ;;  %v95_v49 = vshll.u32 %v888_v46, %v80_v29  ;;  %vm98_vm1 = vcmp.lt.s32.totalorder %v937_v33, 1  ;;  %vm101_vm2 = vcmp.lt.s32.totalorder %v937_v33, 4 }
  0x91   :  { %v84_v43 = vshrl.u32 %v885_v37, %v939_v34  ;;  %v87_v44 = vshrl.u32 %v886_v39, %v939_v34  ;;  %v90_v45 = vshrl.u32 %v887_v41, %v939_v34  ;;  %v93_v47 = vshrl.u32 %v888_v46, %v939_v34 }
  0x92   :  { %v96_v51 = vshrl.u32 %v889_v50, %v939_v34  ;;  %vm100_vm3 = vcmp.lt.s32.totalorder %v937_v33, 3  ;;  %vm99_vm4 = vcmp.lt.s32.totalorder %v937_v33, 2  ;;  %v82_v30 = vshrl.u32 %v884_v35, %v939_v34 }
  0x93   :  { %v85_v54 = vor.u32 %v84_v43, %v83_v36  ;;  %v88_v55 = vor.u32 %v87_v44, %v86_v38  ;;  %v91_v56 = vor.u32 %v90_v45, %v89_v40  ;;  %v94_v57 = vor.u32 %v93_v47, %v92_v42 }
  0x94   :  { %v97_v58 = vor.u32 %v96_v51, %v95_v49 }
  0x95   :  { %v106_v59 = vsel %vm98_vm1, %v85_v54, %v88_v55  ;;  %v107_v60 = vsel %vm101_vm2, %v94_v57, 920167782  ;;  %v110_v61 = vsel %vm98_vm1, %v88_v55, %v91_v56  ;;  %v103_v27 = vsel %vm101_vm2, %v91_v56, 2102212464 }
  0x96   :  { %v108_v62 = vsel %vm100_vm3, %v91_v56, %v107_v60  ;;  %v111_v63 = vsel %vm101_vm2, %v97_v58, 1326507024  ;;  %v102_v39 = vsel %vm98_vm1, %v82_v30, %v85_v54  ;;  %v104_v40 = vsel %vm100_vm3, %v88_v55, %v103_v27 }
  0x97   :  { %v112_v1 = vsel %vm100_vm3, %v94_v57, %v111_v63  ;;  %v109_v3 = vsel %vm99_vm4, %v106_v59, %v108_v62  ;;  %v105_v35 = vsel %vm99_vm4, %v102_v39, %v104_v40 }
  0x98   :  { %v113_v5 = vsel %vm99_vm4, %v110_v61, %v112_v1  ;;  %v139_v6 = vand.u32 65535, %v109_v3  ;;  %v140_v7 = vshrl.u32 %v109_v3, 16  ;;  %v159_v49 = vmul.u32 %v947_v52, %v105_v35 }
  0x99   :  { %v117_v8 = vand.u32 65535, %v113_v5  ;;  %v118_v9 = vshrl.u32 %v113_v5, 16  ;;  %vm209_vm4 = vweird.f32 %v931_v15 }
  0x9a   :  { %v142_v10 = vmul.u32 %v140_v7, %v115_v2  ;;  %v143_v11 = vmul.u32 %v139_v6, %v116_v4  ;;  %v141_v14 = vmul.u32 %v139_v6, %v115_v2  ;;  %v144_v19 = vmul.u32 %v140_v7, %v116_v4 }
  0x9b   :  { %v120_v12 = vmul.u32 %v118_v9, %v115_v2  ;;  %v121_v13 = vmul.u32 %v117_v8, %v116_v4  ;;  %v119_v17 = vmul.u32 %v117_v8, %v115_v2  ;;  %v122_v20 = vmul.u32 %v118_v9, %v116_v4 }
  0x9c   :  { %v145_v16 = vshll.u32 %v142_v10, 16  ;;  %v147_v21 = vshll.u32 %v143_v11, 16  ;;  %v146_v37 = vshrl.u32 %v142_v10, 16  ;;  %v148_v43 = vshrl.u32 %v143_v11, 16 }
  0x9d   :  { %v123_v18 = vshll.u32 %v120_v12, 16  ;;  %v125_v24 = vshll.u32 %v121_v13, 16  ;;  %v124_v41 = vshrl.u32 %v120_v12, 16  ;;  %v126_v45 = vshrl.u32 %v121_v13, 16 }
  0x9e   :  { %vm149_vm5 = vc.u32 %v141_v14, %v145_v16  ;;  %v151_v23 = vadd.s32 %v145_v16, %v141_v14 }
  0x9f   :  { %vm127_vm6 = vc.u32 %v119_v17, %v123_v18  ;;  %v129_v25 = vadd.s32 %v123_v18, %v119_v17  ;;  %v150_v26 = vsel %vm149_vm5, 1, %v883_v0 }
  0xa0   :  { %v128_v28 = vsel %vm127_vm6, 1, %v883_v0  ;;  %v152_v29 = vadd.s32 %v150_v26, %v144_v19  ;;  %vm153_vm7 = vc.u32 %v151_v23, %v147_v21 }
  0xa1   :  { %v130_v31 = vadd.s32 %v128_v28, %v122_v20  ;;  %vm131_vm8 = vc.u32 %v129_v25, %v125_v24  ;;  %v154_v32 = vsel %vm153_vm7, 1, %v883_v0 }
  0xa2   :  { %v132_v36 = vsel %vm131_vm8, 1, %v883_v0  ;;  %v156_v38 = vadd.s32 %v154_v32, %v152_v29  ;;  %v155_v0 = vadd.s32 %v151_v23, %v147_v21 }
  0xa3   :  { %v134_v42 = vadd.s32 %v132_v36, %v130_v31 }
  0xa4   :  { %v157_v44 = vadd.s32 %v156_v38, %v146_v37 }
  0xa5   :  { %v135_v34 = vadd.s32 %v134_v42, %v124_v41 }
  0xa6   :  { %v158_v46 = vadd.s32 %v157_v44, %v148_v43 }
  0xa7   :  { %v136_v47 = vadd.s32 %v135_v34, %v126_v45 }
  0xa8   :  { %v162_v48 = vadd.s32 1, %v158_v46 }
  0xa9   :  { %vm161_vm9 = vc.u32 %v136_v47, %v155_v0  ;;  %v160_v61 = vadd.s32 %v155_v0, %v136_v47  ;;  %v780_v47 = vld [vmem:[#allocation5 + $0x30] sm:$0xff]  ;;  %v779_v0 = vld [vmem:[#allocation5 + $0x28] sm:$0xff] }
  0xaa   :  { %v163_v50 = vsel %vm161_vm9, %v162_v48, %v158_v46  ;;  %v781_v46 = vld [vmem:[#allocation5 + $0x38] sm:$0xff]  ;;  %v778_v48 = vld [vmem:[#allocation5 + $0x20] sm:$0xff] }
  0xab   :  { %v164_v51 = vadd.s32 %v163_v50, %v159_v49  ;;  %622 = vmatpush.bf16.msra.mxu2 %v781_v46  ;;  %v777_v49 = vld [vmem:[#allocation5 + $0x18] sm:$0xff] }
  0xad   :  { %v165_v53 = vadd.s32 536870912, %v164_v51 }
  0xaf   :  { %v166_v54 = vshrl.u32 %v165_v53, 30  ;;  %623 = vmatpush.bf16.msra.mxu2 %v780_v47 }
  0xb1   :  { %v167_v55 = vshll.u32 %v166_v54, 30  ;;  %v190_v11 = vsub.s32 4, %v166_v54 }
  0xb3   :  { %v168_v56 = vsub.s32 %v164_v51, %v167_v55  ;;  %v191_v17 = vsel %vm68_vm12, %v190_v11, %v166_v54  ;;  %624 = vmatpush.bf16.msra.mxu2 %v779_v0  ;;  %v776_v51 = vld [vmem:[#allocation5 + $0x10] sm:$0xff]  ;;  %v775_v54 = vld [vmem:[#allocation5 + $0x8] sm:$0xff] }
  0xb4   :  { %v193_v20 = vsel %vm67_vm13, 0, %v191_v17 }
  0xb5   :  { %vm169_vm10 = vcmp.lt.s32.totalorder %v168_v56, 0  ;;  %v170_v57 = vsub.s32 0, %v168_v56  ;;  %v364_v26 = vadd.s32 3, %v193_v20  ;;  %v210_v30 = vand.u32 3, %v193_v20 }
  0xb7   :  { %v171_v58 = vsel %vm169_vm10, %v170_v57, %v168_v56  ;;  %v365_v31 = vand.u32 3, %v364_v26  ;;  %vm211_vm14 = vcmp.lt.s32.totalorder %v210_v30, 2  ;;  %vm212_vm15 = vcmp.eq.s32.totalorder %v210_v30, 0  ;;  %625 = vmatpush.bf16.msra.mxu2 %v778_v48 }
  0xb8   :  { %v172_v59 = vclz %v171_v58  ;;  %vm215_vm0 = vcmp.eq.s32.totalorder %v210_v30, 2  ;;  %v774_v58 = vld [vmem:[#allocation5] sm:$0xff] }
  0xb9   :  { %vm366_vm1 = vcmp.lt.s32.totalorder %v365_v31, 2  ;;  %vm367_vm2 = vcmp.eq.s32.totalorder %v365_v31, 0  ;;  %vm370_vm3 = vcmp.eq.s32.totalorder %v365_v31, 2 }
  0xba   :  { %v656_v60 = vadd.s32 4294967294, %v172_v59 }
  0xbb   :  { %626 = vmatpush.bf16.msra.mxu2 %v777_v49 }
  0xbc   :  { %vm657_vm11 = vcmp.lt.s32.totalorder %v656_v60, 0 }
  0xbd   :  { %v175_v33 = vsel %vm657_vm11, 0, %v656_v60 }
  0xbe   :  { %v176_v62 = vsub.s32 32, %v175_v33  ;;  %v180_v63 = vsub.s32 4294967266, %v175_v33  ;;  %v177_v1 = vshll.u32 %v168_v56, %v175_v33 }
  0xbf   :  { %627 = vmatpush.bf16.msra.mxu2 %v776_v51 }
  0xc0   :  { %v178_v2 = vshrl.u32 %v160_v61, %v176_v62  ;;  %v181_v52 = vadd.s32 127, %v180_v63 }
  0xc2   :  { %v179_v3 = vor.u32 %v178_v2, %v177_v1  ;;  %v182_v4 = vshll.u32 %v181_v52, 23 }
  0xc3   :  { %628 = vmatpush.bf16.msra.mxu2 %v775_v54 }
  0xc4   :  { %v183_v5 = vor.u32 4788187, %v182_v4  ;;  %v186_v7 = vcvt.s32.f32 %v179_v3 }
  0xc6   :  { %v184_v6 = vand.u32 2147483647, %v183_v5 }
  0xc7   :  { %629 = vmatpush.bf16.msra.mxu2 %v774_v58 }
  0xc8   :  { %v187_v8 = vmul.f32 %v186_v7, %v184_v6 }
  0xca   :  { %v188_v9 = vxor.u32 2147483648, %v187_v8 }
  0xcc   :  { %v189_v10 = vsel %vm68_vm12, %v188_v9, %v187_v8 }
  0xcd   :  { %v192_v12 = vsel %vm67_vm13, %v931_v15, %v189_v10  ;;  %v409_v15 = vld [vmem:[%s1002_s2] sm:$0x1] }
  0xce   :  { %v194_v13 = vmul.f32 %v192_v12, %v192_v12  ;;  %v410_v50 = vunpack.c.l.bf16 %v409_v15 }
  0xd0   :  { %v195_v14 = vmul.f32 -0.001358992, %v194_v13  ;;  %v202_v16 = vmul.f32 -0.00019511016, %v194_v13  ;;  %v411_v53 = vperm.slane %v410_v50, 0 }
  0xd2   :  { %v196_v18 = vadd.f32 0.041655596, %v195_v14  ;;  %v203_v19 = vadd.f32 0.008332121, %v202_v16 }
  0xd4   :  { %v197_v21 = vmul.f32 %v196_v18, %v194_v13  ;;  %v204_v23 = vmul.f32 %v203_v19, %v194_v13 }
  0xd6   :  { %v198_v24 = vadd.f32 -0.4999988, %v197_v21  ;;  %v205_v25 = vadd.f32 -0.16666654, %v204_v23 }
  0xd8   :  { %v199_v27 = vmul.f32 %v198_v24, %v194_v13  ;;  %v206_v28 = vmul.f32 %v205_v25, %v194_v13 }
  0xda   :  { %v200_v29 = vadd.f32 1.0, %v199_v27  ;;  %v207_v22 = vadd.f32 1.0, %v206_v28 }
  0xdc   :  { %v208_v32 = vmul.f32 %v207_v22, %v192_v12  ;;  %v216_v36 = vxor.u32 2147483648, %v200_v29  ;;  %v571_v12 = vld [vmem:[%s1004_s4] sm:$0x1] }
  0xdd   :  { %v572_v13 = vunpack.c.l.bf16 %v571_v12 }
  0xde   :  { %v213_v37 = vxor.u32 2147483648, %v208_v32  ;;  %v217_v39 = vsel %vm215_vm0, %v216_v36, %v208_v32  ;;  %v372_v41 = vsel %vm370_vm3, %v216_v36, %v208_v32 }
  0xdf   :  { %v573_v14 = vperm.slane %v572_v13, 0 }
  0xe0   :  { %v214_v38 = vsel %vm212_vm15, %v200_v29, %v213_v37  ;;  %v369_v40 = vsel %vm367_vm2, %v200_v29, %v213_v37 }
  0xe1   :  { %v218_v42 = vsel %vm211_vm14, %v214_v38, %v217_v39  ;;  %v373_v43 = vsel %vm366_vm1, %v369_v40, %v372_v41 }
  0xe2   :  { %v219_v44 = vsel %vm209_vm4, nan, %v218_v42  ;;  %v374_v45 = vsel %vm209_vm4, nan, %v373_v43 }
  0xe3   :  { %v375_v34 = vpack.c.bf16 %v219_v44, %v219_v44  ;;  %v376_v35 = vpack.c.bf16 %v374_v45, %v374_v45 }
  0xe5   :  { %516 = vmatmul.bf16.vlgmr.msra.gmra.mxu0 %v375_v34  ;;  %529 = vmatmul.bf16.vlgmr.msra.gmra.mxu1 %v376_v35 }
 0x162   :  { %v517_v55 = vpop.f32.mrf.mxu0  ;;  %v530_v56 = vpop.f32.mrf.mxu1 }
 0x163   :  { %v518_v57 = vadd.f32 %v517_v55, %v411_v53 }
 0x165   :  { %v531_v59 = vadd.f32 %v530_v56, %v518_v57 }
 0x167   :  { %v725_v60 = vmul.f32 -1.442695, %v531_v59 }
 0x169   :  { %797 = vpow2.f32 %v725_v60 }
 0x16a   :  { %v519_v33 = vpop.f32.mrf.mxu0  ;;  %v532_v61 = vpop.f32.mrf.mxu1 }
 0x16f   :  { %v798_v62 = vpop.eup %797 }
 0x170   :  { %v537_v63 = vadd.f32 1.0, %v798_v62 }
 0x172   :  { %799 = vrcp.f32 %v537_v63  ;;  %v549_v3 = vand.u32 2147483648, %v537_v63  ;;  %v547_v5 = vand.u32 2147483647, %v537_v63  ;;  %vm543_vm6 = vweird.f32 %v537_v63 }
 0x174   :  { %v550_v7 = vor.u32 1.1754944e-38, %v549_v3  ;;  %vm548_vm8 = vcmp.eq.f32.partialorder %v547_v5, 8.507059e+37 }
 0x178   :  { %v800_v1 = vpop.eup %799 }
 0x179   :  { %v539_v2 = vmul.f32 %v800_v1, %v537_v63  ;;  %vm544_vm5 = vweird.f32 %v800_v1 }
 0x17a   :  { %vm545_vm7 = vmor %vm543_vm6, %vm544_vm5 }
 0x17b   :  { %v540_v52 = vsub.f32 1.0, %v539_v2 }
 0x17d   :  { %v541_v4 = vmul.f32 %v800_v1, %v540_v52 }
 0x17f   :  { %v542_v6 = vadd.f32 %v800_v1, %v541_v4 }
 0x181   :  { %v546_v8 = vsel %vm545_vm7, %v800_v1, %v542_v6 }
 0x182   :  { %v551_v9 = vsel %vm548_vm8, %v550_v7, %v546_v8 }
 0x183   :  { %v553_v10 = vmul.f32 %v551_v9, %v531_v59 }
 0x185   :  { %v554_v11 = vpack.c.bf16 %v553_v10, %v553_v10 }
 0x187   :  { %630 = vmatmul.bf16.vlgmr.msra.gmra.mxu2 %v554_v11 }
 0x20a   :  { %v631_v16 = vpop.f32.mrf.mxu2 }
 0x20b   :  { %v632_v17 = vadd.f32 %v631_v16, %v573_v14 }
 0x20d   :  { %v635_v18 = vpack.c.bf16 %v632_v17, %v632_v17 }
 0x20f   :  { %636 = vst [vmem:[#allocation7] sm:$0xf] %v635_v18 }
 0x210   :  { %647 = dma.vmem_to_hbm [thread:$0]  %s643_s8, 64, %s645_s11, [#allocation4]  }
 0x212   :  { %v633_v19 = vpop.f32.mrf.mxu2 }
 0x213   :  { %877 = dma.done.wait [#allocation4], 64  }
 0x214   :  { %878 = vsyncadd [#allocation4], 4294967232 }
 0x215   :  { %652 = vsyncpa [#allocation3], 1 }
 0x216   :  { %653 = vsyncpa [#allocation6], 1 }
 0x217   :  { %654 = vsyncpa [#allocation4], 1 }

</bundles_post_ra>
